<compile_context>
chip_gen: v5e
topology: v5e:2x2
jax: 0.10.0
libtpu: 0.0.40
codegen_flags: <defaults>
</compile_context>

<pallas_src>
import jax
import jax.numpy as jnp
from jax.experimental import pallas as pl
from jax.experimental.pallas import tpu as pltpu

INPUT_SIZE = 32
HIDDEN_SIZES = (32, 32, 32)
LN_EPS = 1e-5


def _round_up(n, m):
    return ((n + m - 1) // m) * m


def _melodynet_kernel(
    x_ref,
    w0_ref, b0_ref, g0_ref, be0_ref,
    w1_ref, b1_ref, g1_ref, be1_ref,
    w2_ref, b2_ref, g2_ref, be2_ref,
    wo_ref, bo_ref,
    out_ref,
):
    """Fused MLP: (Linear -> LayerNorm -> ReLU -> [dropout=id] -> residual)x3 -> Linear."""
    x = x_ref[...]  # (tb, D) float32

    layer_params = (
        (w0_ref, b0_ref, g0_ref, be0_ref),
        (w1_ref, b1_ref, g1_ref, be1_ref),
        (w2_ref, b2_ref, g2_ref, be2_ref),
    )

    for i, (w_ref, b_ref, g_ref, be_ref) in enumerate(layer_params):
        identity = x
        # Linear: x @ W (W pre-transposed to (in, out)) + b
        h = jnp.dot(x, w_ref[...], preferred_element_type=jnp.float32) + b_ref[...]
        # Fused LayerNorm over the feature (last) axis, eps = 1e-5:
        #   var = E[h^2] - mu^2 ; scale = gamma * rsqrt(var + eps)
        #   h   = h * scale + (beta - mu * scale)
        mu = jnp.mean(h, axis=-1, keepdims=True)
        var = jnp.mean(h * h, axis=-1, keepdims=True) - mu * mu
        scale = g_ref[...] * jax.lax.rsqrt(var + LN_EPS)
        h = h * scale + (be_ref[...] - mu * scale)
        # Activation: ReLU
        h = jnp.maximum(h, 0.0)
        # Dropout: identity at inference (eval mode)
        # Residual: use_residual and self.residual and i > 0
        if i > 0:
            h = h + identity
        x = h

    # Output head: contract features of w_out (1, D) against features of x (tb, D)
    # -> (1, tb) lane-dense row (no width-1 masked stores).
    head = jax.lax.dot_general(
        wo_ref[...], x,
        dimension_numbers=(((1,), (1,)), ((), ())),
        preferred_element_type=jnp.float32,
    )
    out_ref[...] = head + bo_ref[...]


def _choose_tile(B, tile_b):
    """Pick an effective batch tile: multiple of 8 (sublane), multiple of 128
    for multi-step grids (lane-dense output blocks), and split into >= 2 grid
    steps when the batch is big enough so both v7x TensorCores get work."""
    if B <= tile_b:
        tb = _round_up(max(B, 8), 8)
        if tb >= 256:
            tb = _round_up(tb, 256) // 2   # >= 128, multiple of 128, 2 grid steps
        return tb
    return max(128, (tile_b // 128) * 128)


def melodynet_forward(x, params, *, tile_b=512):
    """x: (B, INPUT_SIZE) float32. params: dict of weights (see init_params)."""
    B, D = x.shape
    assert D == INPUT_SIZE

    tb = _choose_tile(B, tile_b)
    B_pad = _round_up(B, tb)
    if B_pad != B:
        x = jnp.pad(x, ((0, B_pad - B), (0, 0)))

    # Flatten parameter list in kernel-argument order.
    flat_params = []
    for i in range(len(HIDDEN_SIZES)):
        flat_params += [
            params[f"w{i}"], params[f"b{i}"],
            params[f"gamma{i}"], params[f"beta{i}"],
        ]
    flat_params += [params["w_out"], params["b_out"]]

    grid = (B_pad // tb,)

    # x tiled over batch (sublane axis); every parameter is a single full-array
    # block replicated across grid steps. Bind rank per-lambda (no late binding).
    in_specs = [pl.BlockSpec((tb, D), lambda i: (i, 0))]
    for p in flat_params:
        in_specs.append(pl.BlockSpec(p.shape, lambda i, _r=p.ndim: (0,) * _r))

    # Lane-dense output: one (1, tb) row slab per grid step into a (1, B_pad) row.
    out_specs = pl.BlockSpec((1, tb), lambda i: (0, i))

    out = pl.pallas_call(
        _melodynet_kernel,
        out_shape=jax.ShapeDtypeStruct((1, B_pad), jnp.float32),
        grid_spec=pltpu.PrefetchScalarGridSpec(
            num_scalar_prefetch=0,
            grid=grid,
            in_specs=in_specs,
            out_specs=out_specs,
        ),
        compiler_params=pltpu.CompilerParams(
            dimension_semantics=("parallel",),
        ),
    )(x, *flat_params)

    return out[0, :B].reshape(B, 1)


def init_params(key):
    """Deterministic parameter init mimicking the module's __init__ shapes.

    nn.Linear(in, out): weight (out, in), bias (out,)
      hidden layers  -> weight stored transposed as (in, out)
      output head    -> weight kept as a (1, in) row (contracted on features in-kernel)
    nn.LayerNorm(h):  weight (h,) = 1, bias (h,) = 0 -> stored as (1, h)
    """
    params = {}
    prev = INPUT_SIZE
    for i, h in enumerate(HIDDEN_SIZES):
        key, kw, kb = jax.random.split(key, 3)
        bound = 1.0 / jnp.sqrt(prev)
        w = jax.random.uniform(kw, (h, prev), jnp.float32, -bound, bound)
        b = jax.random.uniform(kb, (h,), jnp.float32, -bound, bound)
        params[f"w{i}"] = w.T                                  # (prev, h)
        params[f"b{i}"] = b.reshape(1, h)                      # (1, h)
        params[f"gamma{i}"] = jnp.ones((1, h), jnp.float32)    # LayerNorm weight
        params[f"beta{i}"] = jnp.zeros((1, h), jnp.float32)    # LayerNorm bias
        prev = h
    key, kw, kb = jax.random.split(key, 3)
    bound = 1.0 / jnp.sqrt(prev)
    w_out = jax.random.uniform(kw, (1, prev), jnp.float32, -bound, bound)
    b_out = jax.random.uniform(kb, (1,), jnp.float32, -bound, bound)
    params["w_out"] = w_out                                    # (1, prev)
    params["b_out"] = b_out.reshape(1, 1)                      # (1, 1)
    return params


def reference_forward(x, params):
    """Pure-JAX reference of the PyTorch forward (eval mode)."""
    h = x.astype(jnp.float32)
    for i in range(len(HIDDEN_SIZES)):
        identity = h
        y = h @ params[f"w{i}"] + params[f"b{i}"]
        mu = jnp.mean(y, axis=-1, keepdims=True)
        var = jnp.mean(jnp.square(y - mu), axis=-1, keepdims=True)
        y = (y - mu) / jnp.sqrt(var + LN_EPS)
        y = y * params[f"gamma{i}"] + params[f"beta{i}"]
        y = jnp.maximum(y, 0.0)
        if i > 0:
            y = y + identity
        h = y
    return h @ params["w_out"].T + params["b_out"]


if __name__ == "__main__":
    key = jax.random.PRNGKey(0)
    params = init_params(key)

    # Small deterministic checks: one clean batch, one that exercises padding.
    for B in (16, 20):
        key, kx = jax.random.split(key)
        x = jax.random.normal(kx, (B, INPUT_SIZE), jnp.float32)

        out = melodynet_forward(x, params)
        out = jax.block_until_ready(out)

        ref = reference_forward(x, params)
        assert out.shape == (B, 1)
        assert jnp.allclose(out, ref, atol=1e-4, rtol=1e-4), (
            f"mismatch at B={B}: max abs err = {jnp.max(jnp.abs(out - ref))}"
        )

    print("KERNEL_OK")
</pallas_src>

<mosaic_0001>
module attributes {stable_mosaic.version = 11 : i64} {
  func.func @_melodynet_kernel(%arg0: i32, %arg1: memref<16x32xf32, #tpu.memory_space<vmem>>, %arg2: memref<32x32xf32, #tpu.memory_space<vmem>>, %arg3: memref<1x32xf32, #tpu.memory_space<vmem>>, %arg4: memref<1x32xf32, #tpu.memory_space<vmem>>, %arg5: memref<1x32xf32, #tpu.memory_space<vmem>>, %arg6: memref<32x32xf32, #tpu.memory_space<vmem>>, %arg7: memref<1x32xf32, #tpu.memory_space<vmem>>, %arg8: memref<1x32xf32, #tpu.memory_space<vmem>>, %arg9: memref<1x32xf32, #tpu.memory_space<vmem>>, %arg10: memref<32x32xf32, #tpu.memory_space<vmem>>, %arg11: memref<1x32xf32, #tpu.memory_space<vmem>>, %arg12: memref<1x32xf32, #tpu.memory_space<vmem>>, %arg13: memref<1x32xf32, #tpu.memory_space<vmem>>, %arg14: memref<1x32xf32, #tpu.memory_space<vmem>>, %arg15: memref<1x1xf32, #tpu.memory_space<vmem>>, %arg16: memref<1x16xf32, #tpu.memory_space<vmem>>) attributes {dimension_semantics = [#tpu.dimension_semantics<parallel>], iteration_bounds = array<i64: 1>, scalar_prefetch = 0 : i64, scratch_operands = 0 : i64, tpu.core_type = #tpu.core_type<tc>, window_params = [{transform_indices = @transform_0, window_bounds = array<i64: 16, 32>}, {pipeline_mode = #tpu.pipeline_mode<synchronous>, transform_indices = @transform_1, window_bounds = array<i64: 32, 32>}, {pipeline_mode = #tpu.pipeline_mode<synchronous>, transform_indices = @transform_2, window_bounds = array<i64: 1, 32>}, {pipeline_mode = #tpu.pipeline_mode<synchronous>, transform_indices = @transform_3, window_bounds = array<i64: 1, 32>}, {pipeline_mode = #tpu.pipeline_mode<synchronous>, transform_indices = @transform_4, window_bounds = array<i64: 1, 32>}, {pipeline_mode = #tpu.pipeline_mode<synchronous>, transform_indices = @transform_5, window_bounds = array<i64: 32, 32>}, {pipeline_mode = #tpu.pipeline_mode<synchronous>, transform_indices = @transform_6, window_bounds = array<i64: 1, 32>}, {pipeline_mode = #tpu.pipeline_mode<synchronous>, transform_indices = @transform_7, window_bounds = array<i64: 1, 32>}, {pipeline_mode = #tpu.pipeline_mode<synchronous>, transform_indices = @transform_8, window_bounds = array<i64: 1, 32>}, {pipeline_mode = #tpu.pipeline_mode<synchronous>, transform_indices = @transform_9, window_bounds = array<i64: 32, 32>}, {pipeline_mode = #tpu.pipeline_mode<synchronous>, transform_indices = @transform_10, window_bounds = array<i64: 1, 32>}, {pipeline_mode = #tpu.pipeline_mode<synchronous>, transform_indices = @transform_11, window_bounds = array<i64: 1, 32>}, {pipeline_mode = #tpu.pipeline_mode<synchronous>, transform_indices = @transform_12, window_bounds = array<i64: 1, 32>}, {pipeline_mode = #tpu.pipeline_mode<synchronous>, transform_indices = @transform_13, window_bounds = array<i64: 1, 32>}, {pipeline_mode = #tpu.pipeline_mode<synchronous>, transform_indices = @transform_14, window_bounds = array<i64: 1, 1>}, {transform_indices = @transform_15, window_bounds = array<i64: 1, 16>}]} {
    %c0 = arith.constant 0 : index
    %c0_0 = arith.constant 0 : index
    %0 = vector.load %arg1[%c0, %c0_0] : memref<16x32xf32, #tpu.memory_space<vmem>>, vector<16x32xf32>
    %c0_1 = arith.constant 0 : index
    %c0_2 = arith.constant 0 : index
    %1 = vector.load %arg2[%c0_1, %c0_2] : memref<32x32xf32, #tpu.memory_space<vmem>>, vector<32x32xf32>
    %cst = arith.constant dense<0.000000e+00> : vector<16x32xf32>
    %2 = tpu.matmul %0, %1, %cst {dimension_numbers = #tpu.dot_dimension_numbers<[1], [0], [0], [1], [0, 0, 1, 1], [], []>} : vector<16x32xf32>, vector<32x32xf32>, vector<16x32xf32> -> vector<16x32xf32>
    %c0_3 = arith.constant 0 : index
    %c0_4 = arith.constant 0 : index
    %3 = vector.load %arg3[%c0_3, %c0_4] : memref<1x32xf32, #tpu.memory_space<vmem>>, vector<1x32xf32>
    %4 = vector.broadcast %3 : vector<1x32xf32> to vector<16x32xf32>
    %5 = arith.addf %2, %4 : vector<16x32xf32>
    %cst_5 = arith.constant dense<0.000000e+00> : vector<16xf32>
    %6 = vector.multi_reduction <add>, %5, %cst_5 [1] : vector<16x32xf32> to vector<16xf32>
    %7 = vector.shape_cast %6 : vector<16xf32> to vector<16x1xf32>
    %cst_6 = arith.constant 3.200000e+01 : f32
    %8 = vector.broadcast %cst_6 : f32 to vector<16x1xf32>
    %9 = arith.divf %7, %8 : vector<16x1xf32>
    %10 = arith.mulf %5, %5 : vector<16x32xf32>
    %cst_7 = arith.constant dense<0.000000e+00> : vector<16xf32>
    %11 = vector.multi_reduction <add>, %10, %cst_7 [1] : vector<16x32xf32> to vector<16xf32>
    %12 = vector.shape_cast %11 : vector<16xf32> to vector<16x1xf32>
    %cst_8 = arith.constant 3.200000e+01 : f32
    %13 = vector.broadcast %cst_8 : f32 to vector<16x1xf32>
    %14 = arith.divf %12, %13 : vector<16x1xf32>
    %15 = arith.mulf %9, %9 : vector<16x1xf32>
    %16 = arith.subf %14, %15 : vector<16x1xf32>
    %c0_9 = arith.constant 0 : index
    %c0_10 = arith.constant 0 : index
    %17 = vector.load %arg4[%c0_9, %c0_10] : memref<1x32xf32, #tpu.memory_space<vmem>>, vector<1x32xf32>
    %cst_11 = arith.constant 9.99999974E-6 : f32
    %18 = vector.broadcast %cst_11 : f32 to vector<16x1xf32>
    %19 = arith.addf %16, %18 : vector<16x1xf32>
    %20 = math.rsqrt %19 : vector<16x1xf32>
    %21 = vector.broadcast %17 : vector<1x32xf32> to vector<16x32xf32>
    %22 = vector.broadcast %20 : vector<16x1xf32> to vector<16x32xf32>
    %23 = arith.mulf %21, %22 : vector<16x32xf32>
    %24 = arith.mulf %5, %23 : vector<16x32xf32>
    %c0_12 = arith.constant 0 : index
    %c0_13 = arith.constant 0 : index
    %25 = vector.load %arg5[%c0_12, %c0_13] : memref<1x32xf32, #tpu.memory_space<vmem>>, vector<1x32xf32>
    %26 = vector.broadcast %9 : vector<16x1xf32> to vector<16x32xf32>
    %27 = arith.mulf %26, %23 : vector<16x32xf32>
    %28 = vector.broadcast %25 : vector<1x32xf32> to vector<16x32xf32>
    %29 = arith.subf %28, %27 : vector<16x32xf32>
    %30 = arith.addf %24, %29 : vector<16x32xf32>
    %cst_14 = arith.constant 0.000000e+00 : f32
    %31 = vector.broadcast %cst_14 : f32 to vector<16x32xf32>
    %32 = arith.maximumf %30, %31 : vector<16x32xf32>
    %c0_15 = arith.constant 0 : index
    %c0_16 = arith.constant 0 : index
    %33 = vector.load %arg6[%c0_15, %c0_16] : memref<32x32xf32, #tpu.memory_space<vmem>>, vector<32x32xf32>
    %cst_17 = arith.constant dense<0.000000e+00> : vector<16x32xf32>
    %34 = tpu.matmul %32, %33, %cst_17 {dimension_numbers = #tpu.dot_dimension_numbers<[1], [0], [0], [1], [0, 0, 1, 1], [], []>} : vector<16x32xf32>, vector<32x32xf32>, vector<16x32xf32> -> vector<16x32xf32>
    %c0_18 = arith.constant 0 : index
    %c0_19 = arith.constant 0 : index
    %35 = vector.load %arg7[%c0_18, %c0_19] : memref<1x32xf32, #tpu.memory_space<vmem>>, vector<1x32xf32>
    %36 = vector.broadcast %35 : vector<1x32xf32> to vector<16x32xf32>
    %37 = arith.addf %34, %36 : vector<16x32xf32>
    %cst_20 = arith.constant dense<0.000000e+00> : vector<16xf32>
    %38 = vector.multi_reduction <add>, %37, %cst_20 [1] : vector<16x32xf32> to vector<16xf32>
    %39 = vector.shape_cast %38 : vector<16xf32> to vector<16x1xf32>
    %cst_21 = arith.constant 3.200000e+01 : f32
    %40 = vector.broadcast %cst_21 : f32 to vector<16x1xf32>
    %41 = arith.divf %39, %40 : vector<16x1xf32>
    %42 = arith.mulf %37, %37 : vector<16x32xf32>
    %cst_22 = arith.constant dense<0.000000e+00> : vector<16xf32>
    %43 = vector.multi_reduction <add>, %42, %cst_22 [1] : vector<16x32xf32> to vector<16xf32>
    %44 = vector.shape_cast %43 : vector<16xf32> to vector<16x1xf32>
    %cst_23 = arith.constant 3.200000e+01 : f32
    %45 = vector.broadcast %cst_23 : f32 to vector<16x1xf32>
    %46 = arith.divf %44, %45 : vector<16x1xf32>
    %47 = arith.mulf %41, %41 : vector<16x1xf32>
    %48 = arith.subf %46, %47 : vector<16x1xf32>
    %c0_24 = arith.constant 0 : index
    %c0_25 = arith.constant 0 : index
    %49 = vector.load %arg8[%c0_24, %c0_25] : memref<1x32xf32, #tpu.memory_space<vmem>>, vector<1x32xf32>
    %cst_26 = arith.constant 9.99999974E-6 : f32
    %50 = vector.broadcast %cst_26 : f32 to vector<16x1xf32>
    %51 = arith.addf %48, %50 : vector<16x1xf32>
    %52 = math.rsqrt %51 : vector<16x1xf32>
    %53 = vector.broadcast %49 : vector<1x32xf32> to vector<16x32xf32>
    %54 = vector.broadcast %52 : vector<16x1xf32> to vector<16x32xf32>
    %55 = arith.mulf %53, %54 : vector<16x32xf32>
    %56 = arith.mulf %37, %55 : vector<16x32xf32>
    %c0_27 = arith.constant 0 : index
    %c0_28 = arith.constant 0 : index
    %57 = vector.load %arg9[%c0_27, %c0_28] : memref<1x32xf32, #tpu.memory_space<vmem>>, vector<1x32xf32>
    %58 = vector.broadcast %41 : vector<16x1xf32> to vector<16x32xf32>
    %59 = arith.mulf %58, %55 : vector<16x32xf32>
    %60 = vector.broadcast %57 : vector<1x32xf32> to vector<16x32xf32>
    %61 = arith.subf %60, %59 : vector<16x32xf32>
    %62 = arith.addf %56, %61 : vector<16x32xf32>
    %cst_29 = arith.constant 0.000000e+00 : f32
    %63 = vector.broadcast %cst_29 : f32 to vector<16x32xf32>
    %64 = arith.maximumf %62, %63 : vector<16x32xf32>
    %65 = arith.addf %64, %32 : vector<16x32xf32>
    %c0_30 = arith.constant 0 : index
    %c0_31 = arith.constant 0 : index
    %66 = vector.load %arg10[%c0_30, %c0_31] : memref<32x32xf32, #tpu.memory_space<vmem>>, vector<32x32xf32>
    %cst_32 = arith.constant dense<0.000000e+00> : vector<16x32xf32>
    %67 = tpu.matmul %65, %66, %cst_32 {dimension_numbers = #tpu.dot_dimension_numbers<[1], [0], [0], [1], [0, 0, 1, 1], [], []>} : vector<16x32xf32>, vector<32x32xf32>, vector<16x32xf32> -> vector<16x32xf32>
    %c0_33 = arith.constant 0 : index
    %c0_34 = arith.constant 0 : index
    %68 = vector.load %arg11[%c0_33, %c0_34] : memref<1x32xf32, #tpu.memory_space<vmem>>, vector<1x32xf32>
    %69 = vector.broadcast %68 : vector<1x32xf32> to vector<16x32xf32>
    %70 = arith.addf %67, %69 : vector<16x32xf32>
    %cst_35 = arith.constant dense<0.000000e+00> : vector<16xf32>
    %71 = vector.multi_reduction <add>, %70, %cst_35 [1] : vector<16x32xf32> to vector<16xf32>
    %72 = vector.shape_cast %71 : vector<16xf32> to vector<16x1xf32>
    %cst_36 = arith.constant 3.200000e+01 : f32
    %73 = vector.broadcast %cst_36 : f32 to vector<16x1xf32>
    %74 = arith.divf %72, %73 : vector<16x1xf32>
    %75 = arith.mulf %70, %70 : vector<16x32xf32>
    %cst_37 = arith.constant dense<0.000000e+00> : vector<16xf32>
    %76 = vector.multi_reduction <add>, %75, %cst_37 [1] : vector<16x32xf32> to vector<16xf32>
    %77 = vector.shape_cast %76 : vector<16xf32> to vector<16x1xf32>
    %cst_38 = arith.constant 3.200000e+01 : f32
    %78 = vector.broadcast %cst_38 : f32 to vector<16x1xf32>
    %79 = arith.divf %77, %78 : vector<16x1xf32>
    %80 = arith.mulf %74, %74 : vector<16x1xf32>
    %81 = arith.subf %79, %80 : vector<16x1xf32>
    %c0_39 = arith.constant 0 : index
    %c0_40 = arith.constant 0 : index
    %82 = vector.load %arg12[%c0_39, %c0_40] : memref<1x32xf32, #tpu.memory_space<vmem>>, vector<1x32xf32>
    %cst_41 = arith.constant 9.99999974E-6 : f32
    %83 = vector.broadcast %cst_41 : f32 to vector<16x1xf32>
    %84 = arith.addf %81, %83 : vector<16x1xf32>
    %85 = math.rsqrt %84 : vector<16x1xf32>
    %86 = vector.broadcast %82 : vector<1x32xf32> to vector<16x32xf32>
    %87 = vector.broadcast %85 : vector<16x1xf32> to vector<16x32xf32>
    %88 = arith.mulf %86, %87 : vector<16x32xf32>
    %89 = arith.mulf %70, %88 : vector<16x32xf32>
    %c0_42 = arith.constant 0 : index
    %c0_43 = arith.constant 0 : index
    %90 = vector.load %arg13[%c0_42, %c0_43] : memref<1x32xf32, #tpu.memory_space<vmem>>, vector<1x32xf32>
    %91 = vector.broadcast %74 : vector<16x1xf32> to vector<16x32xf32>
    %92 = arith.mulf %91, %88 : vector<16x32xf32>
    %93 = vector.broadcast %90 : vector<1x32xf32> to vector<16x32xf32>
    %94 = arith.subf %93, %92 : vector<16x32xf32>
    %95 = arith.addf %89, %94 : vector<16x32xf32>
    %cst_44 = arith.constant 0.000000e+00 : f32
    %96 = vector.broadcast %cst_44 : f32 to vector<16x32xf32>
    %97 = arith.maximumf %95, %96 : vector<16x32xf32>
    %98 = arith.addf %97, %65 : vector<16x32xf32>
    %c0_45 = arith.constant 0 : index
    %c0_46 = arith.constant 0 : index
    %99 = vector.load %arg14[%c0_45, %c0_46] : memref<1x32xf32, #tpu.memory_space<vmem>>, vector<1x32xf32>
    %cst_47 = arith.constant dense<0.000000e+00> : vector<1x16xf32>
    %100 = tpu.matmul %99, %98, %cst_47 {dimension_numbers = #tpu.dot_dimension_numbers<[1], [1], [0], [0], [0, 0, 1, 0], [], []>} : vector<1x32xf32>, vector<16x32xf32>, vector<1x16xf32> -> vector<1x16xf32>
    %c0_48 = arith.constant 0 : index
    %c0_49 = arith.constant 0 : index
    %101 = vector.load %arg15[%c0_48, %c0_49] : memref<1x1xf32, #tpu.memory_space<vmem>>, vector<1x1xf32>
    %102 = vector.broadcast %101 : vector<1x1xf32> to vector<1x16xf32>
    %103 = arith.addf %100, %102 : vector<1x16xf32>
    %c0_50 = arith.constant 0 : index
    %c0_51 = arith.constant 0 : index
    %104 = vector.load %arg16[%c0_50, %c0_51] : memref<1x16xf32, #tpu.memory_space<vmem>>, vector<1x16xf32>
    tpu.vector_store %arg16[%c0_50, %c0_51], %103 {strides = array<i32>} : memref<1x16xf32, #tpu.memory_space<vmem>>, vector<1x16xf32>,
    return
  }
  func.func @transform_0(%arg0: i32) -> (i32, i32) {
    %c0_i32 = arith.constant 0 : i32
    %c0_i32_0 = arith.constant 0 : i32
    return %arg0, %c0_i32 : i32, i32
  }
  func.func @transform_1(%arg0: i32) -> (i32, i32) {
    %c0_i32 = arith.constant 0 : i32
    %c0_i32_0 = arith.constant 0 : i32
    %c0_i32_1 = arith.constant 0 : i32
    return %c0_i32, %c0_i32_0 : i32, i32
  }
  func.func @transform_2(%arg0: i32) -> (i32, i32) {
    %c0_i32 = arith.constant 0 : i32
    %c0_i32_0 = arith.constant 0 : i32
    %c0_i32_1 = arith.constant 0 : i32
    return %c0_i32, %c0_i32_0 : i32, i32
  }
  func.func @transform_3(%arg0: i32) -> (i32, i32) {
    %c0_i32 = arith.constant 0 : i32
    %c0_i32_0 = arith.constant 0 : i32
    %c0_i32_1 = arith.constant 0 : i32
    return %c0_i32, %c0_i32_0 : i32, i32
  }
  func.func @transform_4(%arg0: i32) -> (i32, i32) {
    %c0_i32 = arith.constant 0 : i32
    %c0_i32_0 = arith.constant 0 : i32
    %c0_i32_1 = arith.constant 0 : i32
    return %c0_i32, %c0_i32_0 : i32, i32
  }
  func.func @transform_5(%arg0: i32) -> (i32, i32) {
    %c0_i32 = arith.constant 0 : i32
    %c0_i32_0 = arith.constant 0 : i32
    %c0_i32_1 = arith.constant 0 : i32
    return %c0_i32, %c0_i32_0 : i32, i32
  }
  func.func @transform_6(%arg0: i32) -> (i32, i32) {
    %c0_i32 = arith.constant 0 : i32
    %c0_i32_0 = arith.constant 0 : i32
    %c0_i32_1 = arith.constant 0 : i32
    return %c0_i32, %c0_i32_0 : i32, i32
  }
  func.func @transform_7(%arg0: i32) -> (i32, i32) {
    %c0_i32 = arith.constant 0 : i32
    %c0_i32_0 = arith.constant 0 : i32
    %c0_i32_1 = arith.constant 0 : i32
    return %c0_i32, %c0_i32_0 : i32, i32
  }
  func.func @transform_8(%arg0: i32) -> (i32, i32) {
    %c0_i32 = arith.constant 0 : i32
    %c0_i32_0 = arith.constant 0 : i32
    %c0_i32_1 = arith.constant 0 : i32
    return %c0_i32, %c0_i32_0 : i32, i32
  }
  func.func @transform_9(%arg0: i32) -> (i32, i32) {
    %c0_i32 = arith.constant 0 : i32
    %c0_i32_0 = arith.constant 0 : i32
    %c0_i32_1 = arith.constant 0 : i32
    return %c0_i32, %c0_i32_0 : i32, i32
  }
  func.func @transform_10(%arg0: i32) -> (i32, i32) {
    %c0_i32 = arith.constant 0 : i32
    %c0_i32_0 = arith.constant 0 : i32
    %c0_i32_1 = arith.constant 0 : i32
    return %c0_i32, %c0_i32_0 : i32, i32
  }
  func.func @transform_11(%arg0: i32) -> (i32, i32) {
    %c0_i32 = arith.constant 0 : i32
    %c0_i32_0 = arith.constant 0 : i32
    %c0_i32_1 = arith.constant 0 : i32
    return %c0_i32, %c0_i32_0 : i32, i32
  }
  func.func @transform_12(%arg0: i32) -> (i32, i32) {
    %c0_i32 = arith.constant 0 : i32
    %c0_i32_0 = arith.constant 0 : i32
    %c0_i32_1 = arith.constant 0 : i32
    return %c0_i32, %c0_i32_0 : i32, i32
  }
  func.func @transform_13(%arg0: i32) -> (i32, i32) {
    %c0_i32 = arith.constant 0 : i32
    %c0_i32_0 = arith.constant 0 : i32
    %c0_i32_1 = arith.constant 0 : i32
    return %c0_i32, %c0_i32_0 : i32, i32
  }
  func.func @transform_14(%arg0: i32) -> (i32, i32) {
    %c0_i32 = arith.constant 0 : i32
    %c0_i32_0 = arith.constant 0 : i32
    %c0_i32_1 = arith.constant 0 : i32
    return %c0_i32, %c0_i32_0 : i32, i32
  }
  func.func @transform_15(%arg0: i32) -> (i32, i32) {
    %c0_i32 = arith.constant 0 : i32
    %c0_i32_0 = arith.constant 0 : i32
    return %c0_i32, %arg0 : i32, i32
  }
}

</mosaic_0001>

<bundles_post_ra>
// kernel: tpu_custom_call.1
= control target key start
LH: loop header
LB: loop body
LE: loop exit
PB: predicated region body
PF: predicated region fallthrough
CT: control target
= control target key end

     0   :  { %s879_s0 = inlined_call_operand.hbm [shape: f32[16,32], index: 0, kind: input, shape index: {}]   ;;  %s880_s1 = inlined_call_operand.hbm [shape: f32[32,32], index: 1, kind: input, shape index: {}]   ;;  %s881_s2 = inlined_call_operand.vmem [shape: f32[1,32], index: 2, kind: input, shape index: {}]   ;;  %s882_s3 = inlined_call_operand.vmem [shape: f32[1,32], index: 3, kind: input, shape index: {}]   ;;  %s883_s4 = inlined_call_operand.vmem [shape: f32[1,32], index: 4, kind: input, shape index: {}]   ;;  %s884_s5 = inlined_call_operand.hbm [shape: f32[32,32], index: 5, kind: input, shape index: {}]   ;;  %s885_s6 = inlined_call_operand.vmem [shape: f32[1,32], index: 6, kind: input, shape index: {}]   ;;  %s886_s7 = inlined_call_operand.vmem [shape: f32[1,32], index: 7, kind: input, shape index: {}]   ;;  %s887_s8 = inlined_call_operand.vmem [shape: f32[1,32], index: 8, kind: input, shape index: {}]   ;;  %s888_s9 = inlined_call_operand.hbm [shape: f32[32,32], index: 9, kind: input, shape index: {}]   ;;  %s889_s10 = inlined_call_operand.vmem [shape: f32[1,32], index: 10, kind: input, shape index: {}]   ;;  %s890_s11 = inlined_call_operand.vmem [shape: f32[1,32], index: 11, kind: input, shape index: {}]   ;;  %s891_s12 = inlined_call_operand.vmem [shape: f32[1,32], index: 12, kind: input, shape index: {}]   ;;  %s892_s13 = inlined_call_operand.vmem [shape: f32[1,32], index: 13, kind: input, shape index: {}]   ;;  %s893_s14 = inlined_call_operand.<no memory space> [shape: f32[1,1], index: 14, kind: input, shape index: {}]   ;;  %s894_s15 = inlined_call_operand.hbm [shape: f32[1,16], index: 15, kind: output, shape index: {}]  }
   0x1   :  { %v20_v0 = vstv %s893_s14 }
   0x2   :  { %21 = vst [vmem:[#allocation2] sm:$0x1] %v20_v0 }
   0x3   :  { %22 = vsyncpa [#allocation4], 0 }
   0x4   :  { %23 = vsyncpa [#allocation7], 0 }
   0x5   :  { %24 = vsyncpa [#allocation10], 0 }
   0x6   :  { %25 = vsyncpa [#allocation5], 0  ;;  %s43_s22 = sshll.u32 %s880_s1, 4  ;;  %s661_s23 = smov [#allocation6]   ;;  %s44_s22 = int_to_ptr.hbm [resolvable:$true] %s43_s22 }
   0x7   :  { %s45_s24 = sshll.u32 %s661_s23, 4  ;;  %s30_s27 = sshll.u32 %s879_s0, 4  ;;  %s46_s24 = int_to_ptr.vmem [resolvable:$true] %s45_s24  ;;  %s31_s27 = int_to_ptr.hbm [resolvable:$true] %s30_s27 }
   0x8   :  { %s662_s28 = smov 128   ;;  %s663_s29 = smov 8  }
   0x9   :  { %51 = dma.hbm_to_vmem [thread:$0]  %s44_s22, 512, %s46_s24, [#allocation7], %s662_s28, %s662_s28, %s663_s29  }
   0xa   :  { %s664_s14 = smov [#allocation3]   ;;  %s62_s18 = sshll.u32 %s884_s5, 4  ;;  %s63_s18 = int_to_ptr.hbm [resolvable:$true] %s62_s18 }
   0xb   :  { %s32_s30 = sshll.u32 %s664_s14, 4  ;;  %s81_s20 = sshll.u32 %s888_s9, 4  ;;  %s33_s30 = int_to_ptr.vmem [resolvable:$true] %s32_s30  ;;  %s82_s20 = int_to_ptr.hbm [resolvable:$true] %s81_s20 }
   0xc   :  { %38 = dma.hbm_to_vmem [thread:$0]  %s31_s27, 256, %s33_s30, [#allocation4], %s662_s28, %s662_s28, %s663_s29  }
   0xd   :  { %s665_s21 = smov [#allocation8]   ;;  %s666_s0 = smov [#allocation9]  }
   0xe   :  { %s64_s23 = sshll.u32 %s665_s21, 4  ;;  %s83_s22 = sshll.u32 %s666_s0, 4  ;;  %s65_s23 = int_to_ptr.vmem [resolvable:$true] %s64_s23  ;;  %s84_s22 = int_to_ptr.vmem [resolvable:$true] %s83_s22 }
   0xf   :  { %70 = dma.hbm_to_vmem [thread:$0]  %s63_s18, 512, %s65_s23, [#allocation7], %s662_s28, %s662_s28, %s663_s29  }
  0x10   :  { %89 = dma.hbm_to_vmem [thread:$0]  %s82_s20, 512, %s84_s22, [#allocation10], %s662_s28, %s662_s28, %s663_s29  }
  0x11   :  { %653 = dma.done.wait [#allocation4], 256  }
  0x12   :  { %654 = vsyncadd [#allocation4], 4294967040 }
  0x13   :  { %655 = dma.done.wait [#allocation7], 1024  }
  0x14   :  { %656 = vsyncadd [#allocation7], 4294966272 }
  0x15   :  { %657 = dma.done.wait [#allocation10], 512  }
  0x16   :  { %658 = vsyncadd [#allocation10], 4294966784  ;;  %v121_v1 = vld [vmem:[#allocation6 + $0x18] sm:$0xff]  ;;  %v120_v2 = vld [vmem:[#allocation6 + $0x10] sm:$0xff]  ;;  %vm126_vm0 = vcmask 261120   ;;  %v667_v18 = vmov 32.0  }
  0x17   :  { %145 = vmatpush.msra.mxu0 %v121_v1  ;;  %v119_v3 = vld [vmem:[#allocation6 + $0x8] sm:$0xff]  ;;  %v118_v4 = vld [vmem:[#allocation6] sm:$0xff]  ;;  %v116_v5 = vld [vmem:[#allocation3] sm:$0xff]  ;;  %519 = vrcp.f32 %v667_v18  ;;  %s669_s17 = smov [#allocation11]   ;;  %s479_s20 = sshll.u32 %s894_s15, 4  ;;  %s480_s20 = int_to_ptr.hbm [resolvable:$true] %s479_s20 }
  0x18   :  { %v117_v6 = vld [vmem:[#allocation3 + $0x8] sm:$0xff]  ;;  %v510_v7 = vld [vmem:[%s881_s2] ss:$0 sm:$0xff]  ;;  %v229_v28 = vld [vmem:[#allocation8 + $0x10] sm:$0xff]  ;;  %s477_s18 = sshll.u32 %s669_s17, 4  ;;  %s478_s18 = int_to_ptr.vmem [resolvable:$true] %s477_s18 }
  0x19   :  { %146 = vmatpush.msra.mxu0 %v120_v2  ;;  %v230_v26 = vld [vmem:[#allocation8 + $0x18] sm:$0xff]  ;;  %v228_v29 = vld [vmem:[#allocation8 + $0x8] sm:$0xff]  ;;  %v227_v30 = vld [vmem:[#allocation8] sm:$0xff] }
  0x1a   :  { %253 = vmatpush.msra.mxu1 %v230_v26  ;;  %v511_v49 = vld [vmem:[%s882_s3] ss:$0 sm:$0xff] }
  0x1b   :  { %147 = vmatpush.msra.mxu0 %v119_v3  ;;  %v512_v55 = vld [vmem:[%s883_s4] ss:$0 sm:$0xff] }
  0x1c   :  { %254 = vmatpush.msra.mxu1 %v229_v28 }
  0x1d   :  { %148 = vmatpush.msra.mxu0 %v118_v4  ;;  %v520_v19 = vpop.eup %519 }
  0x1e   :  { %491 = vmatmul.msk.f32.vlgmr.msra.gmra.mxu0 %vm126_vm0, %v116_v5  ;;  %v163_v20 = vmul.f32 32.0, %v520_v19  ;;  %vm167_vm1 = vweird.f32 %v520_v19  ;;  %255 = vmatpush.msra.mxu1 %v228_v29 }
  0x20   :  { %v164_v21 = vsub.f32 1.0, %v163_v20  ;;  %256 = vmatpush.msra.mxu1 %v227_v30  ;;  %v332_v20 = vld [vmem:[#allocation9 + $0x10] sm:$0xff] }
  0x22   :  { %v165_v22 = vmul.f32 %v520_v19, %v164_v21  ;;  %v331_v21 = vld [vmem:[#allocation9 + $0x8] sm:$0xff] }
  0x24   :  { %v166_v23 = vadd.f32 %v520_v19, %v165_v22 }
  0x26   :  { %492 = vmatmul.msk.f32.gmra.mxu0 %vm126_vm0, %v117_v6  ;;  %v784_v25 = vsel %vm167_vm1, %v520_v19, %v166_v23  ;;  %v333_v19 = vld [vmem:[#allocation9 + $0x18] sm:$0xff]  ;;  %v330_v23 = vld [vmem:[#allocation9] sm:$0xff] }
  0x27   :  { %356 = vmatpush.msra.mxu2 %v333_v19 }
  0x29   :  { %357 = vmatpush.msra.mxu2 %v332_v20 }
  0x2b   :  { %358 = vmatpush.msra.mxu2 %v331_v21 }
  0x2d   :  { %359 = vmatpush.msra.mxu2 %v330_v23 }
  0x9b   :  { %v150_v8 = vpop.f32.mrf.mxu0 }
  0x9c   :  { %v770_v9 = vadd.f32 %v510_v7, %v150_v8 }
  0x9e   :  { %v156_v10 = vsel %vm126_vm0, %v770_v9, 0.0  ;;  %v171_v11 = vmul.f32 %v770_v9, %v770_v9 }
  0x9f   :  { %157 = vadd.xlane.f32.xlu0 %v156_v10 }
  0xa0   :  { %v173_v15 = vsel %vm126_vm0, %v171_v11, 0.0 }
  0xa3   :  { %v153_v12 = vpop.f32.mrf.mxu0 }
  0xa4   :  { %v776_v13 = vadd.f32 %v510_v7, %v153_v12  ;;  %v513_v7 = vld [vmem:[%s885_s6] ss:$0 sm:$0xff] }
  0xa6   :  { %v159_v14 = vsel %vm126_vm0, %v776_v13, 0.0  ;;  %v172_v16 = vmul.f32 %v776_v13, %v776_v13 }
  0xa7   :  { %160 = vadd.xlane.f32.xlu1 %v159_v14  ;;  %174 = vadd.xlane.f32.xlu0 %v173_v15 }
  0xa8   :  { %v176_v17 = vsel %vm126_vm0, %v172_v16, 0.0 }
  0xaf   :  { %177 = vadd.xlane.f32.xlu1 %v176_v17 }
 0x112   :  { %v158_v24 = vpop.xlane.xlu0 %157 }
 0x113   :  { %v169_v27 = vmul.f32 %v784_v25, %v158_v24 }
 0x115   :  { %v181_v33 = vmul.f32 %v169_v27, %v169_v27 }
 0x11a   :  { %v161_v31 = vpop.xlane.xlu1 %160  ;;  %v175_v32 = vpop.xlane.xlu0 %174 }
 0x11b   :  { %v179_v34 = vmul.f32 %v175_v32, %v784_v25  ;;  %v170_v35 = vmul.f32 %v784_v25, %v161_v31 }
 0x11d   :  { %v183_v36 = vsub.f32 %v179_v34, %v181_v33  ;;  %v182_v38 = vmul.f32 %v170_v35, %v170_v35 }
 0x11f   :  { %v186_v37 = vadd.f32 1e-05, %v183_v36 }
 0x121   :  { %521 = vrsqrt.f32 %v186_v37  ;;  %vm194_vm3 = vweird.f32 %v186_v37 }
 0x122   :  { %v178_v39 = vpop.xlane.xlu1 %177 }
 0x123   :  { %v180_v40 = vmul.f32 %v178_v39, %v784_v25 }
 0x125   :  { %v184_v41 = vsub.f32 %v180_v40, %v182_v38 }
 0x127   :  { %v522_v42 = vpop.eup %521  ;;  %v187_v43 = vadd.f32 1e-05, %v184_v41 }
 0x128   :  { %v189_v44 = vmul.f32 %v522_v42, %v186_v37  ;;  %vm195_vm2 = vweird.f32 %v522_v42 }
 0x129   :  { %523 = vrsqrt.f32 %v187_v43  ;;  %vm196_vm4 = vmor %vm194_vm3, %vm195_vm2  ;;  %vm204_vm6 = vweird.f32 %v187_v43 }
 0x12a   :  { %v190_v45 = vmul.f32 %v522_v42, %v189_v44 }
 0x12c   :  { %v191_v46 = vmul.f32 0.5, %v190_v45 }
 0x12e   :  { %v192_v47 = vsub.f32 1.5, %v191_v46  ;;  %v514_v46 = vld [vmem:[%s886_s7] ss:$0 sm:$0xff] }
 0x12f   :  { %v524_v48 = vpop.eup %523 }
 0x130   :  { %v193_v50 = vmul.f32 %v522_v42, %v192_v47  ;;  %v199_v51 = vmul.f32 %v524_v48, %v187_v43  ;;  %vm205_vm5 = vweird.f32 %v524_v48 }
 0x131   :  { %vm206_vm7 = vmor %vm204_vm6, %vm205_vm5  ;;  %vm470_vm5 = vcmask 122880  }
 0x132   :  { %v200_v52 = vmul.f32 %v524_v48, %v199_v51  ;;  %v197_v53 = vsel %vm196_vm4, %v522_v42, %v193_v50 }
 0x133   :  { %v211_v54 = vmul.f32 %v511_v49, %v197_v53 }
 0x134   :  { %v201_v56 = vmul.f32 0.5, %v200_v52  ;;  %v515_v52 = vld [vmem:[%s887_s8] ss:$0 sm:$0xff] }
 0x135   :  { %v216_v57 = vmul.f32 %v211_v54, %v169_v27  ;;  %v213_v59 = vmul.f32 %v211_v54, %v770_v9 }
 0x136   :  { %v202_v58 = vsub.f32 1.5, %v201_v56 }
 0x137   :  { %v221_v60 = vsub.f32 %v512_v55, %v216_v57 }
 0x138   :  { %v203_v61 = vmul.f32 %v524_v48, %v202_v58 }
 0x139   :  { %v797_v62 = vadd.f32 %v221_v60, %v213_v59 }
 0x13a   :  { %v207_v63 = vsel %vm206_vm7, %v524_v48, %v203_v61 }
 0x13b   :  { %v225_v0 = vmax.f32 %v797_v62, 0.0  ;;  %v212_v1 = vmul.f32 %v511_v49, %v207_v63 }
 0x13d   :  { %493 = vmatmul.msk.f32.vlgmr.msra.gmra.mxu1 %vm126_vm0, %v225_v0  ;;  %v217_v2 = vmul.f32 %v212_v1, %v170_v35  ;;  %v214_v3 = vmul.f32 %v212_v1, %v776_v13 }
 0x13f   :  { %v222_v4 = vsub.f32 %v512_v55, %v217_v2 }
 0x141   :  { %v804_v5 = vadd.f32 %v222_v4, %v214_v3 }
 0x143   :  { %v226_v6 = vmax.f32 %v804_v5, 0.0 }
 0x145   :  { %494 = vmatmul.msk.f32.gmra.mxu1 %vm126_vm0, %v226_v6 }
 0x1ba   :  { %v258_v8 = vpop.f32.mrf.mxu1 }
 0x1bb   :  { %v259_v9 = vadd.f32 %v513_v7, %v258_v8 }
 0x1bd   :  { %v264_v10 = vsel %vm126_vm0, %v259_v9, 0.0  ;;  %v272_v11 = vmul.f32 %v259_v9, %v259_v9 }
 0x1be   :  { %265 = vadd.xlane.f32.xlu2 %v264_v10 }
 0x1bf   :  { %v274_v15 = vsel %vm126_vm0, %v272_v11, 0.0 }
 0x1c2   :  { %v261_v12 = vpop.f32.mrf.mxu1 }
 0x1c3   :  { %v814_v13 = vadd.f32 %v513_v7, %v261_v12  ;;  %v516_v7 = vld [vmem:[%s889_s10] ss:$0 sm:$0xff] }
 0x1c5   :  { %v267_v14 = vsel %vm126_vm0, %v814_v13, 0.0  ;;  %v273_v16 = vmul.f32 %v814_v13, %v814_v13 }
 0x1c6   :  { %268 = vadd.xlane.f32.xlu0 %v267_v14  ;;  %275 = vadd.xlane.f32.xlu2 %v274_v15 }
 0x1c7   :  { %v277_v17 = vsel %vm126_vm0, %v273_v16, 0.0 }
 0x1c8   :  { %278 = vadd.xlane.f32.xlu1 %v277_v17 }
 0x231   :  { %v266_v18 = vpop.xlane.xlu2 %265 }
 0x232   :  { %v270_v22 = vmul.f32 %v266_v18, %v784_v25 }
 0x234   :  { %v282_v27 = vmul.f32 %v270_v22, %v270_v22 }
 0x239   :  { %v269_v24 = vpop.xlane.xlu0 %268  ;;  %v276_v26 = vpop.xlane.xlu2 %275 }
 0x23a   :  { %v271_v28 = vmul.f32 %v269_v24, %v784_v25  ;;  %v280_v29 = vmul.f32 %v276_v26, %v784_v25 }
 0x23b   :  { %v279_v30 = vpop.xlane.xlu1 %278 }
 0x23c   :  { %v283_v31 = vmul.f32 %v271_v28, %v271_v28  ;;  %v284_v32 = vsub.f32 %v280_v29, %v282_v27  ;;  %v281_v33 = vmul.f32 %v279_v30, %v784_v25 }
 0x23e   :  { %v287_v34 = vadd.f32 1e-05, %v284_v32  ;;  %v285_v35 = vsub.f32 %v281_v33, %v283_v31  ;;  %v434_v31 = vld [vmem:[#allocation2] sm:$0x1]  ;;  %v668_v32 = vmov 0  }
 0x23f   :  { %509 = vset.pattern.permute.xlu0 %v668_v32 }
 0x240   :  { %525 = vrsqrt.f32 %v287_v34  ;;  %v288_v36 = vadd.f32 1e-05, %v285_v35  ;;  %vm295_vm9 = vweird.f32 %v287_v34 }
 0x242   :  { %527 = vrsqrt.f32 %v288_v36  ;;  %vm305_vm12 = vweird.f32 %v288_v36 }
 0x246   :  { %v526_v37 = vpop.eup %525 }
 0x247   :  { %v290_v38 = vmul.f32 %v526_v37, %v287_v34  ;;  %vm296_vm8 = vweird.f32 %v526_v37 }
 0x248   :  { %v528_v39 = vpop.eup %527  ;;  %vm297_vm11 = vmor %vm295_vm9, %vm296_vm8 }
 0x249   :  { %v291_v40 = vmul.f32 %v526_v37, %v290_v38  ;;  %v300_v41 = vmul.f32 %v528_v39, %v288_v36  ;;  %vm306_vm10 = vweird.f32 %v528_v39  ;;  %v517_v38 = vld [vmem:[%s890_s11] ss:$0 sm:$0xff] }
 0x24a   :  { %vm307_vm13 = vmor %vm305_vm12, %vm306_vm10 }
 0x24b   :  { %v292_v42 = vmul.f32 0.5, %v291_v40  ;;  %v301_v43 = vmul.f32 %v528_v39, %v300_v41 }
 0x24d   :  { %v293_v44 = vsub.f32 1.5, %v292_v42  ;;  %v302_v45 = vmul.f32 0.5, %v301_v43  ;;  %v518_v43 = vld [vmem:[%s891_s12] ss:$0 sm:$0xff] }
 0x24f   :  { %v294_v47 = vmul.f32 %v526_v37, %v293_v44  ;;  %v303_v48 = vsub.f32 1.5, %v302_v45 }
 0x251   :  { %v298_v49 = vsel %vm297_vm11, %v526_v37, %v294_v47  ;;  %v304_v50 = vmul.f32 %v528_v39, %v303_v48 }
 0x252   :  { %v312_v51 = vmul.f32 %v514_v46, %v298_v49 }
 0x253   :  { %v308_v53 = vsel %vm307_vm13, %v528_v39, %v304_v50 }
 0x254   :  { %v317_v54 = vmul.f32 %v312_v51, %v270_v22  ;;  %v313_v55 = vmul.f32 %v514_v46, %v308_v53  ;;  %v314_v56 = vmul.f32 %v312_v51, %v259_v9 }
 0x256   :  { %v322_v57 = vsub.f32 %v515_v52, %v317_v54  ;;  %v318_v58 = vmul.f32 %v313_v55, %v271_v28  ;;  %v315_v63 = vmul.f32 %v313_v55, %v814_v13 }
 0x258   :  { %v324_v59 = vadd.f32 %v322_v57, %v314_v56  ;;  %v323_v60 = vsub.f32 %v515_v52, %v318_v58 }
 0x25a   :  { %v326_v61 = vmax.f32 %v324_v59, 0.0  ;;  %v325_v2 = vadd.f32 %v323_v60, %v315_v63  ;;  %v433_v60 = vld [vmem:[%s892_s13] sm:$0x1] }
 0x25c   :  { %v835_v1 = vadd.f32 %v326_v61, %v225_v0  ;;  %v327_v3 = vmax.f32 %v325_v2, 0.0 }
 0x25e   :  { %495 = vmatmul.msk.f32.vlgmr.msra.gmra.mxu2 %vm126_vm0, %v835_v1  ;;  %v841_v4 = vadd.f32 %v327_v3, %v226_v6 }
 0x266   :  { %496 = vmatmul.msk.f32.gmra.mxu2 %vm126_vm0, %v841_v4 }
 0x2e1   :  { %v361_v8 = vpop.f32.mrf.mxu2 }
 0x2e2   :  { %v848_v62 = vadd.f32 %v516_v7, %v361_v8 }
 0x2e4   :  { %v367_v0 = vsel %vm126_vm0, %v848_v62, 0.0  ;;  %v375_v12 = vmul.f32 %v848_v62, %v848_v62 }
 0x2e5   :  { %368 = vadd.xlane.f32.xlu1 %v367_v0 }
 0x2e6   :  { %v377_v13 = vsel %vm126_vm0, %v375_v12, 0.0 }
 0x2e9   :  { %v364_v9 = vpop.f32.mrf.mxu2 }
 0x2ea   :  { %v365_v10 = vadd.f32 %v516_v7, %v364_v9 }
 0x2ec   :  { %v370_v5 = vsel %vm126_vm0, %v365_v10, 0.0  ;;  %v376_v6 = vmul.f32 %v365_v10, %v365_v10 }
 0x2ed   :  { %371 = vadd.xlane.f32.xlu2 %v370_v5 }
 0x2ee   :  { %v380_v11 = vsel %vm126_vm0, %v376_v6, 0.0 }
 0x2ef   :  { %381 = vadd.xlane.f32.xlu0 %v380_v11 }
 0x2f5   :  { %378 = vadd.xlane.f32.xlu2 %v377_v13 }
 0x303   :  { %437 = vperm.xlu0 %509, %v434_v31  }
 0x358   :  { %v369_v16 = vpop.xlane.xlu1 %368 }
 0x359   :  { %v373_v20 = vmul.f32 %v369_v16, %v784_v25 }
 0x35b   :  { %v385_v24 = vmul.f32 %v373_v20, %v373_v20 }
 0x360   :  { %v372_v14 = vpop.xlane.xlu2 %371 }
 0x361   :  { %v374_v15 = vmul.f32 %v372_v14, %v784_v25 }
 0x362   :  { %v382_v17 = vpop.xlane.xlu0 %381 }
 0x363   :  { %v386_v18 = vmul.f32 %v374_v15, %v374_v15  ;;  %v384_v19 = vmul.f32 %v382_v17, %v784_v25 }
 0x365   :  { %v388_v21 = vsub.f32 %v384_v19, %v386_v18 }
 0x367   :  { %v391_v22 = vadd.f32 1e-05, %v388_v21 }
 0x368   :  { %v379_v23 = vpop.xlane.xlu2 %378 }
 0x369   :  { %529 = vrsqrt.f32 %v391_v22  ;;  %v383_v26 = vmul.f32 %v379_v23, %v784_v25  ;;  %vm408_vm15 = vweird.f32 %v391_v22 }
 0x36b   :  { %v387_v27 = vsub.f32 %v383_v26, %v385_v24 }
 0x36d   :  { %v390_v28 = vadd.f32 1e-05, %v387_v27 }
 0x36f   :  { %v530_v29 = vpop.eup %529  ;;  %531 = vrsqrt.f32 %v390_v28  ;;  %vm398_vm3 = vweird.f32 %v390_v28 }
 0x370   :  { %v403_v30 = vmul.f32 %v530_v29, %v391_v22  ;;  %vm409_vm14 = vweird.f32 %v530_v29 }
 0x371   :  { %vm410_vm1 = vmor %vm408_vm15, %vm409_vm14 }
 0x372   :  { %v404_v33 = vmul.f32 %v530_v29, %v403_v30 }
 0x374   :  { %v405_v34 = vmul.f32 0.5, %v404_v33 }
 0x375   :  { %v532_v35 = vpop.eup %531  ;;  %v438_v61 = vpop.permute.xlu0 %437 }
 0x376   :  { %v406_v36 = vsub.f32 1.5, %v405_v34  ;;  %v393_v37 = vmul.f32 %v532_v35, %v390_v28  ;;  %vm399_vm2 = vweird.f32 %v532_v35  ;;  %v440_v63 = vperm.slane %v438_v61, 0 }
 0x377   :  { %vm400_vm4 = vmor %vm398_vm3, %vm399_vm2 }
 0x378   :  { %v407_v25 = vmul.f32 %v530_v29, %v406_v36  ;;  %v394_v39 = vmul.f32 %v532_v35, %v393_v37 }
 0x37a   :  { %v395_v40 = vmul.f32 0.5, %v394_v39  ;;  %v411_v41 = vsel %vm410_vm1, %v530_v29, %v407_v25 }
 0x37b   :  { %v416_v42 = vmul.f32 %v517_v38, %v411_v41 }
 0x37c   :  { %v396_v44 = vsub.f32 1.5, %v395_v40 }
 0x37d   :  { %v421_v45 = vmul.f32 %v416_v42, %v374_v15  ;;  %v418_v47 = vmul.f32 %v416_v42, %v365_v10 }
 0x37e   :  { %v397_v46 = vmul.f32 %v532_v35, %v396_v44 }
 0x37f   :  { %v426_v48 = vsub.f32 %v518_v43, %v421_v45 }
 0x380   :  { %v401_v49 = vsel %vm400_vm4, %v532_v35, %v397_v46 }
 0x381   :  { %v428_v50 = vadd.f32 %v426_v48, %v418_v47  ;;  %v415_v51 = vmul.f32 %v517_v38, %v401_v49 }
 0x383   :  { %v430_v52 = vmax.f32 %v428_v50, 0.0  ;;  %v420_v53 = vmul.f32 %v415_v51, %v373_v20  ;;  %v417_v55 = vmul.f32 %v415_v51, %v848_v62 }
 0x385   :  { %v432_v54 = vadd.f32 %v430_v52, %v841_v4  ;;  %v425_v56 = vsub.f32 %v518_v43, %v420_v53 }
 0x387   :  { %497 = vmatpush.xpose.msk.msra.mxu3 %vm126_vm0, %v432_v54  ;;  %v427_v57 = vadd.f32 %v425_v56, %v417_v55 }
 0x389   :  { %v429_v58 = vmax.f32 %v427_v57, 0.0 }
 0x38b   :  { %v431_v59 = vadd.f32 %v429_v58, %v835_v1 }
 0x38d   :  { %498 = vmatpush.xpose.msk.msra.mxu3 %vm126_vm0, %v431_v59 }
 0x390   :  { %499 = vmatmul.msk.f32.vlgmr.msra.gmra.mxu3 %vm126_vm0, %v433_v60 }
 0x413   :  { %v467_v2 = vpop.f32.mrf.mxu3 }
 0x414   :  { %v468_v3 = vadd.f32 %v467_v2, %v440_v63 }
 0x416   :  { %471 = vst.msk [vmem:[#allocation11] sm:$0x1] %vm470_vm5, %v468_v3 }
 0x417   :  { %482 = dma.vmem_to_hbm [thread:$0]  %s478_s18, 16, %s480_s20, [#allocation5]  }
 0x418   :  { %659 = dma.done.wait [#allocation5], 16  }
 0x419   :  { %660 = vsyncadd [#allocation5], 4294967280 }
 0x41a   :  { %487 = vsyncpa [#allocation4], 1 }
 0x41b   :  { %488 = vsyncpa [#allocation7], 1 }
 0x41c   :  { %489 = vsyncpa [#allocation10], 1 }
 0x41d   :  { %490 = vsyncpa [#allocation5], 1 }

</bundles_post_ra>
